<compile_context>
chip_gen: v7x
topology: tpu7x:2x2x1
jax: 0.10.0
libtpu: 0.0.40
codegen_flags: <defaults>
</compile_context>

<pallas_src>
import numpy as np
import jax
import jax.numpy as jnp
from jax.experimental import pallas as pl
from jax.experimental.pallas import tpu as pltpu


def _identity_kernel(x_ref, o_ref):
    # TODO(synk): PyTorch forward() body is `pass` (returns None); there is no
    # compute to reproduce.  Identity copy onto the aliased output is the
    # minimal runnable kernel.
    o_ref[...] = x_ref[...]


def custom_layer(x, *, max_tile_bytes=8 * 1024 * 1024):
    """Pallas equivalent of CustomLayer.forward (which is a no-op)."""
    rows, cols = x.shape
    itemsize = jnp.dtype(x.dtype).itemsize

    # Dtype-aware sublane packing: 8 rows for 32-bit, 16 for 16-bit, 32 for 8-bit.
    sublane_pack = 8 * max(1, 4 // itemsize)

    total_bytes = rows * cols * itemsize
    if total_bytes <= max_tile_bytes:
        # Whole array in one lane-dense block -> grid of 1.
        rows_per_tile = rows
    else:
        rows_per_tile = (max_tile_bytes // (cols * itemsize)) // sublane_pack
        rows_per_tile = max(1, rows_per_tile) * sublane_pack

    tile_bytes = rows_per_tile * cols * itemsize
    # Budget: double-buffered input + output (4 live buffers) + headroom,
    # capped so a v6e-sized tile never blows v7x's 64 MiB physical VMEM.
    vmem_limit = int(min(96 * 2**20, max(1 << 20, 4 * tile_bytes + (1 << 20))))

    grid = (pl.cdiv(rows, rows_per_tile),)

    return pl.pallas_call(
        _identity_kernel,
        out_shape=jax.ShapeDtypeStruct((rows, cols), x.dtype),
        grid_spec=pltpu.PrefetchScalarGridSpec(
            num_scalar_prefetch=0,
            grid=grid,
            in_specs=[pl.BlockSpec((rows_per_tile, cols), lambda i: (i, 0))],
            out_specs=pl.BlockSpec((rows_per_tile, cols), lambda i: (i, 0)),
        ),
        compiler_params=pltpu.CompilerParams(
            dimension_semantics=("parallel",),
            vmem_limit_bytes=vmem_limit,
        ),
        # Output aliases the input buffer: the "copy" produces no new HBM
        # traffic beyond the (unavoidable) launch.
        input_output_aliases={0: 0},
    )(x)


if __name__ == "__main__":
    key = jax.random.PRNGKey(0)
    # Small shape consistent with a generic layer input: [batch*channels, features]
    x = jax.random.normal(key, (16, 256), dtype=jnp.float32)

    # Host copy for the correctness check: input_output_aliases donates x's
    # device buffer, so we must not rely on x remaining live after the call.
    x_host = np.asarray(x)

    out = custom_layer(x)
    jax.block_until_ready(out)

    # Sanity check: identity semantics of the kernel itself.
    assert out.shape == x_host.shape and out.dtype == x_host.dtype
    assert bool(jnp.all(out == jnp.asarray(x_host)))

    print("KERNEL_OK")
</pallas_src>

<mosaic_0001>
module attributes {stable_mosaic.version = 11 : i64} {
  func.func @_identity_kernel(%arg0: i32, %arg1: memref<16x256xf32, #tpu.memory_space<vmem>>, %arg2: memref<16x256xf32, #tpu.memory_space<vmem>>) attributes {dimension_semantics = [#tpu.dimension_semantics<parallel>], iteration_bounds = array<i64: 1>, scalar_prefetch = 0 : i64, scratch_operands = 0 : i64, tpu.core_type = #tpu.core_type<tc>, window_params = [{transform_indices = @transform_0, window_bounds = array<i64: 16, 256>}, {transform_indices = @transform_1, window_bounds = array<i64: 16, 256>}]} {
    %c0 = arith.constant 0 : index
    %c0_0 = arith.constant 0 : index
    %0 = vector.load %arg1[%c0, %c0_0] : memref<16x256xf32, #tpu.memory_space<vmem>>, vector<16x256xf32>
    %c0_1 = arith.constant 0 : index
    %c0_2 = arith.constant 0 : index
    %1 = vector.load %arg2[%c0_1, %c0_2] : memref<16x256xf32, #tpu.memory_space<vmem>>, vector<16x256xf32>
    tpu.vector_store %arg2[%c0_1, %c0_2], %0 {strides = array<i32>} : memref<16x256xf32, #tpu.memory_space<vmem>>, vector<16x256xf32>,
    return
  }
  func.func @transform_0(%arg0: i32) -> (i32, i32) {
    %c0_i32 = arith.constant 0 : i32
    %c0_i32_0 = arith.constant 0 : i32
    return %arg0, %c0_i32 : i32, i32
  }
  func.func @transform_1(%arg0: i32) -> (i32, i32) {
    %c0_i32 = arith.constant 0 : i32
    %c0_i32_0 = arith.constant 0 : i32
    return %arg0, %c0_i32 : i32, i32
  }
}

</mosaic_0001>

<bundles_post_ra>
// kernel: tpu_custom_call.1
= control target key start
LH: loop header
LB: loop body
LE: loop exit
PB: predicated region body
PF: predicated region fallthrough
CT: control target
= control target key end

     0   :  { %6 = vsyncpa [#allocation3], 0  ;;  %s144_s0 = inlined_call_operand.hbm [shape: f32[16,256], index: 0, kind: input, shape index: {}, may-alias: {0,1}]   ;;  %s145_s1 = inlined_call_operand.hbm [shape: f32[16,256], index: 1, kind: output, shape index: {}, may-alias: {0,1}]  }
   0x1   :  { %7 = vsyncpa [#allocation4], 0  ;;  %s100_s6 = smov [#allocation2]   ;;  %s52_s10 = scalar_lea.hbm %s144_s0, 512 }
   0x2   :  { %s13_s7 = sshll.u32 %s100_s6, 4  ;;  %p53_p0 = scmp.ne.s32.totalorder %s144_s0, %s52_s10  ;;  %s14_s7 = int_to_ptr.vmem [resolvable:$true] %s13_s7 }
   0x3   :  { %p56_p1 = scmp.lt.u32.totalorder %s52_s10, %s144_s0 }
   0x5   :  { %p58_p2 = pnand %p56_p1, %p53_p0 }
   0x7   :  { %61 = shalt.err (!%p58_p2)
}
   0x8   :  { %s62_s15 = scalar_lea.vmem %s14_s7, 512  ;;  %p67_p4 = scmp.lt.s32.totalorder %s14_s7, %s14_s7 }
   0x9   :  { %p63_p3 = scmp.ne.s32.totalorder %s14_s7, %s62_s15  ;;  %p68_p5 = scmp.lt.s32.totalorder %s62_s15, %s62_s15 }
   0xb   :  { %p69_p6 = por %p68_p5, %p67_p4 }
   0xd   :  { %p70_p7 = pnand %p69_p6, %p63_p3 }
   0xf   :  { %73 = shalt.err (!%p70_p7)
}
  0x10   :  { %s101_s16 = smov 256   ;;  %s102_s17 = smov 16  }
  0x11   :  { %19 = dma.hbm_to_vmem [thread:$0]  %s144_s0, 512, %s14_s7, [#allocation3], %s101_s16, %s101_s16, %s102_s17  }
  0x12   :  { %96 = dma.done.wait [#allocation3], 512  }
  0x13   :  { %97 = vsyncadd [#allocation3], 4294966784  ;;  %s103_s20 = smov [#allocation5]   ;;  %v23_v0 = vld [vmem:[#allocation2] sm:$0xff]  ;;  %v24_v1 = vld [vmem:[#allocation2 + $0x8] sm:$0xff] }
  0x14   :  { %s36_s21 = sshll.u32 %s103_s20, 4  ;;  %v25_v2 = vld [vmem:[#allocation2 + $0x10] sm:$0xff]  ;;  %27 = vst [vmem:[#allocation5] sm:$0xff] %v23_v0  ;;  %28 = vst [vmem:[#allocation5 + $0x8] sm:$0xff] %v24_v1  ;;  %v26_v3 = vld [vmem:[#allocation2 + $0x18] sm:$0xff]  ;;  %s37_s21 = int_to_ptr.vmem [resolvable:$true] %s36_s21 }
  0x15   :  { %29 = vst [vmem:[#allocation5 + $0x10] sm:$0xff] %v25_v2  ;;  %30 = vst [vmem:[#allocation5 + $0x18] sm:$0xff] %v26_v3  ;;  %s74_s22 = scalar_lea.vmem %s37_s21, 512  ;;  %p79_p9 = scmp.lt.s32.totalorder %s37_s21, %s37_s21 }
  0x16   :  { %p75_p8 = scmp.ne.s32.totalorder %s37_s21, %s74_s22  ;;  %p80_p10 = scmp.lt.s32.totalorder %s74_s22, %s74_s22 }
  0x18   :  { %p81_p11 = por %p80_p10, %p79_p9 }
  0x1a   :  { %p82_p12 = pnand %p81_p11, %p75_p8 }
  0x1c   :  { %85 = shalt.err (!%p82_p12)
}
  0x1d   :  { %s86_s24 = scalar_lea.hbm %s145_s1, 512 }
  0x1e   :  { %p87_p13 = scmp.ne.s32.totalorder %s145_s1, %s86_s24  ;;  %p90_p0 = scmp.lt.u32.totalorder %s86_s24, %s145_s1 }
  0x20   :  { %p92_p1 = pnand %p90_p0, %p87_p13 }
  0x22   :  { %95 = shalt.err (!%p92_p1)
}
  0x23   :  { %42 = dma.vmem_to_hbm [thread:$0]  %s37_s21, 512, %s145_s1, [#allocation4], %s101_s16, %s101_s16, %s102_s17  }
  0x24   :  { %98 = dma.done.wait [#allocation4], 512  }
  0x25   :  { %99 = vsyncadd [#allocation4], 4294966784 }
  0x26   :  { %46 = vsyncpa [#allocation3], 1 }
  0x27   :  { %47 = vsyncpa [#allocation4], 1 }

</bundles_post_ra>
